<compile_context>
chip_gen: v7x
topology: tpu7x:2x2x1
jax: 0.10.0
libtpu: 0.0.40
codegen_flags: <defaults>
</compile_context>

<pallas_src>
import functools

import jax
import jax.numpy as jnp
from jax import lax
from jax.experimental import pallas as pl
from jax.experimental.pallas import tpu as pltpu

INPUT_SIZE = 8
HIDDEN_SIZE = 64
OUTPUT_SIZE = 1

CHUNK = 256                 # batch columns processed per inner-loop step
DEFAULT_BATCH_TILE = 8192   # max batch rows per grid step (multiple of CHUNK)


def _round_up(x: int, m: int) -> int:
    return ((x + m - 1) // m) * m


def pinn_kernel(x_ref, w1_ref, b1_ref, w2_ref, b2_ref, o_ref):
    # x_ref : (TB, INPUT_SIZE)          f32  -- native (batch, feature) layout
    # w1_ref: (HIDDEN_SIZE, INPUT_SIZE) f32  -- PyTorch (out, in) layout
    # b1_ref: (HIDDEN_SIZE, 1)          f32
    # w2_ref: (HIDDEN_SIZE, 1)          f32  -- output weights as a column
    # b2_ref: (1,)                      f32  -- SMEM scalar
    # o_ref : (1, TB)                   f32  -- batch on the lane axis
    w1 = w1_ref[...]
    b1 = b1_ref[...]                       # (HIDDEN, 1): lane-broadcast in the add
    w2 = w2_ref[...]                       # (HIDDEN, 1)
    b2 = b2_ref[0]
    tb = o_ref.shape[1]
    n_chunks = tb // CHUNK                 # static (tb is a multiple of CHUNK)

    def chunk_body(c, carry):
        start = pl.multiple_of(c * CHUNK, CHUNK)
        xc = x_ref[pl.ds(start, CHUNK), :]                        # (CHUNK, IN)
        # h = w1 @ xc.T on the MXU; the 8-wide transpose of xc is folded into
        # the NT dot, so x never round-trips HBM in a transposed layout.
        h = lax.dot_general(w1, xc, (((1,), (1,)), ((), ())),
                            preferred_element_type=jnp.float32)   # (HID, CHUNK)
        act = jnp.maximum(h + b1, 0.0)                            # bias + ReLU
        # N=1 output column: VPU multiply + XLU sublane reduce (no MXU pass).
        y = jnp.sum(act * w2, axis=0, keepdims=True) + b2         # (1, CHUNK)
        o_ref[:, pl.ds(start, CHUNK)] = y.astype(o_ref.dtype)
        return carry

    # Chunk loop keeps each h slice in <= 16 vregs (no VMEM staging of h).
    lax.fori_loop(0, n_chunks, chunk_body, 0, unroll=True)


@functools.partial(jax.jit, static_argnames=("batch_tile",))
def pinn_forward(x, w1, b1, w2, b2, *, batch_tile=DEFAULT_BATCH_TILE):
    """PINN forward.

    x : (B, INPUT_SIZE) f32
    w1: (HIDDEN_SIZE, INPUT_SIZE), b1: (HIDDEN_SIZE,)   -- PyTorch layouts
    w2: (OUTPUT_SIZE, HIDDEN_SIZE), b2: (OUTPUT_SIZE,)
    returns (B, OUTPUT_SIZE) f32
    """
    B = x.shape[0]
    assert x.shape[1] == INPUT_SIZE

    # ---- batch tiling ------------------------------------------------------
    batch_tile = max(CHUNK, _round_up(int(batch_tile), CHUNK))
    b_lane = max(CHUNK, _round_up(B, CHUNK))
    nsteps = pl.cdiv(b_lane, batch_tile)
    if b_lane >= 2 * CHUNK:
        nsteps = max(nsteps, 2)          # v7x: >=2 grid steps so both TCs get work
    tb = _round_up(pl.cdiv(b_lane, nsteps), CHUNK)   # <= batch_tile
    b_pad = nsteps * tb                  # padding waste bounded by nsteps*CHUNK
    grid = (nsteps,)

    # x is consumed in its native (B, 8) layout; only the ragged tail is
    # zero-padded (no transpose / dtype-cast HBM round trip).  Padded rows
    # produce garbage outputs that are sliced off below.
    x_pad = x if b_pad == B else jnp.pad(x, ((0, b_pad - B), (0, 0)))
    w1_f = w1.astype(jnp.float32)
    b1_col = b1.reshape(HIDDEN_SIZE, 1).astype(jnp.float32)
    w2_col = w2.reshape(HIDDEN_SIZE, 1).astype(jnp.float32)   # (1,64) -> (64,1)
    b2_vec = b2.reshape(OUTPUT_SIZE).astype(jnp.float32)

    flops = 2 * b_pad * (INPUT_SIZE * HIDDEN_SIZE + HIDDEN_SIZE)
    bytes_accessed = (b_pad * INPUT_SIZE * 4          # f32 x
                      + b_pad * OUTPUT_SIZE * 4       # f32 out
                      + HIDDEN_SIZE * INPUT_SIZE * 4  # w1
                      + HIDDEN_SIZE * 4 + HIDDEN_SIZE * 4 + OUTPUT_SIZE * 4)

    out_t = pl.pallas_call(
        pinn_kernel,
        out_shape=jax.ShapeDtypeStruct((OUTPUT_SIZE, b_pad), jnp.float32),
        grid_spec=pl.GridSpec(
            grid=grid,
            in_specs=[
                # batch-tiled activations, native row-major layout
                pl.BlockSpec((tb, INPUT_SIZE), lambda i: (i, 0)),
                # small weights / biases stay VMEM-resident across the grid
                pl.BlockSpec((HIDDEN_SIZE, INPUT_SIZE), lambda i: (0, 0)),
                pl.BlockSpec((HIDDEN_SIZE, 1), lambda i: (0, 0)),
                pl.BlockSpec((HIDDEN_SIZE, 1), lambda i: (0, 0)),
                # scalar output bias -> SMEM (no padded VMEM tile + DMA)
                pl.BlockSpec(memory_space=pltpu.MemorySpace.SMEM),
            ],
            out_specs=pl.BlockSpec((OUTPUT_SIZE, tb), lambda i: (0, i)),
        ),
        compiler_params=pltpu.CompilerParams(
            dimension_semantics=("parallel",)),
        cost_estimate=pl.CostEstimate(flops=flops, transcendentals=0,
                                      bytes_accessed=bytes_accessed),
    )(x_pad, w1_f, b1_col, w2_col, b2_vec)

    return out_t[0, :B].reshape(B, OUTPUT_SIZE)


def init_params(key):
    # PyTorch nn.Linear default init: uniform(-1/sqrt(fan_in), 1/sqrt(fan_in)),
    # stored in PyTorch (out_features, in_features) layout.
    k1, k2, k3, k4 = jax.random.split(key, 4)
    bound1 = 1.0 / jnp.sqrt(INPUT_SIZE)
    bound2 = 1.0 / jnp.sqrt(HIDDEN_SIZE)
    w1 = jax.random.uniform(k1, (HIDDEN_SIZE, INPUT_SIZE), jnp.float32,
                            -bound1, bound1)
    b1 = jax.random.uniform(k2, (HIDDEN_SIZE,), jnp.float32, -bound1, bound1)
    w2 = jax.random.uniform(k3, (OUTPUT_SIZE, HIDDEN_SIZE), jnp.float32,
                            -bound2, bound2)
    b2 = jax.random.uniform(k4, (OUTPUT_SIZE,), jnp.float32, -bound2, bound2)
    return w1, b1, w2, b2


if __name__ == "__main__":
    key = jax.random.PRNGKey(0)
    kx, kp = jax.random.split(key)
    batch = 8
    x = jax.random.normal(kx, (batch, INPUT_SIZE), jnp.float32)
    w1, b1, w2, b2 = init_params(kp)

    out = pinn_forward(x, w1, b1, w2, b2)
    out = jax.block_until_ready(out)

    # Pure f32 reference (HIGHEST precision so it is a genuine f32 matmul).
    h_ref = jnp.maximum(
        jnp.dot(x, w1.T, precision=jax.lax.Precision.HIGHEST) + b1, 0.0)
    ref = jnp.dot(h_ref, w2.T, precision=jax.lax.Precision.HIGHEST) + b2

    assert out.shape == (batch, OUTPUT_SIZE)
    # Tolerance covers whatever f32-matmul pass count the MXU uses for the
    # in-kernel dots while still catching any real layout/transpose/bias bug.
    assert jnp.allclose(out, ref, atol=1e-2, rtol=1e-2), "mismatch vs reference"

    print("KERNEL_OK")
</pallas_src>

<mosaic_0001>
module attributes {stable_mosaic.version = 11 : i64} {
  func.func @pinn_kernel(%arg0: i32, %arg1: memref<256x8xf32, #tpu.memory_space<vmem>>, %arg2: memref<64x8xf32, #tpu.memory_space<vmem>>, %arg3: memref<64x1xf32, #tpu.memory_space<vmem>>, %arg4: memref<64x1xf32, #tpu.memory_space<vmem>>, %arg5: memref<1xf32, #tpu.memory_space<smem>>, %arg6: memref<1x256xf32, #tpu.memory_space<vmem>>) attributes {dimension_semantics = [#tpu.dimension_semantics<parallel>], iteration_bounds = array<i64: 1>, scalar_prefetch = 0 : i64, scratch_operands = 0 : i64, tpu.core_type = #tpu.core_type<tc>, window_params = [{transform_indices = @transform_0, window_bounds = array<i64: 256, 8>}, {pipeline_mode = #tpu.pipeline_mode<synchronous>, transform_indices = @transform_1, window_bounds = array<i64: 64, 8>}, {pipeline_mode = #tpu.pipeline_mode<synchronous>, transform_indices = @transform_2, window_bounds = array<i64: 64, 1>}, {pipeline_mode = #tpu.pipeline_mode<synchronous>, transform_indices = @transform_3, window_bounds = array<i64: 64, 1>}, {transform_indices = @transform_4, window_bounds = array<i64: 1>}, {transform_indices = @transform_5, window_bounds = array<i64: 1, 256>}]} {
    %c0 = arith.constant 0 : index
    %c0_0 = arith.constant 0 : index
    %0 = vector.load %arg2[%c0, %c0_0] : memref<64x8xf32, #tpu.memory_space<vmem>>, vector<64x8xf32>
    %c0_1 = arith.constant 0 : index
    %c0_2 = arith.constant 0 : index
    %1 = vector.load %arg3[%c0_1, %c0_2] : memref<64x1xf32, #tpu.memory_space<vmem>>, vector<64x1xf32>
    %c0_3 = arith.constant 0 : index
    %c0_4 = arith.constant 0 : index
    %2 = vector.load %arg4[%c0_3, %c0_4] : memref<64x1xf32, #tpu.memory_space<vmem>>, vector<64x1xf32>
    %c0_5 = arith.constant 0 : index
    %3 = memref.load %arg5[%c0_5] : memref<1xf32, #tpu.memory_space<smem>>
    %c0_i32 = arith.constant 0 : i32
    %c256_i32 = arith.constant 256 : i32
    %4 = arith.muli %c0_i32, %c256_i32 : i32
    %5 = tpu.assume_multiple %4, 256 : i32
    %6 = arith.index_cast %5 : i32 to index
    %c0_6 = arith.constant 0 : index
    %7 = vector.load %arg1[%6, %c0_6] : memref<256x8xf32, #tpu.memory_space<vmem>>, vector<256x8xf32>
    %cst = arith.constant dense<0.000000e+00> : vector<64x256xf32>
    %8 = tpu.matmul %0, %7, %cst {dimension_numbers = #tpu.dot_dimension_numbers<[1], [1], [0], [0], [0, 0, 1, 0], [], []>} : vector<64x8xf32>, vector<256x8xf32>, vector<64x256xf32> -> vector<64x256xf32>
    %9 = vector.broadcast %1 : vector<64x1xf32> to vector<64x256xf32>
    %10 = arith.addf %8, %9 : vector<64x256xf32>
    %cst_7 = arith.constant 0.000000e+00 : f32
    %11 = vector.broadcast %cst_7 : f32 to vector<64x256xf32>
    %12 = arith.maximumf %10, %11 : vector<64x256xf32>
    %13 = vector.broadcast %2 : vector<64x1xf32> to vector<64x256xf32>
    %14 = arith.mulf %12, %13 : vector<64x256xf32>
    %cst_8 = arith.constant dense<0.000000e+00> : vector<256xf32>
    %15 = vector.multi_reduction <add>, %14, %cst_8 [0] : vector<64x256xf32> to vector<256xf32>
    %16 = vector.shape_cast %15 : vector<256xf32> to vector<1x256xf32>
    %17 = vector.broadcast %3 : f32 to vector<1x256xf32>
    %18 = arith.addf %16, %17 : vector<1x256xf32>
    %c0_9 = arith.constant 0 : index
    %19 = arith.index_cast %5 : i32 to index
    %20 = vector.load %arg6[%c0_9, %19] : memref<1x256xf32, #tpu.memory_space<vmem>>, vector<1x256xf32>
    tpu.vector_store %arg6[%c0_9, %19], %18 {strides = array<i32>} : memref<1x256xf32, #tpu.memory_space<vmem>>, vector<1x256xf32>,
    %c1_i32 = arith.constant 1 : i32
    return
  }
  func.func @transform_0(%arg0: i32) -> (i32, i32) {
    %c0_i32 = arith.constant 0 : i32
    %c0_i32_0 = arith.constant 0 : i32
    return %arg0, %c0_i32 : i32, i32
  }
  func.func @transform_1(%arg0: i32) -> (i32, i32) {
    %c0_i32 = arith.constant 0 : i32
    %c0_i32_0 = arith.constant 0 : i32
    %c0_i32_1 = arith.constant 0 : i32
    return %c0_i32, %c0_i32_0 : i32, i32
  }
  func.func @transform_2(%arg0: i32) -> (i32, i32) {
    %c0_i32 = arith.constant 0 : i32
    %c0_i32_0 = arith.constant 0 : i32
    %c0_i32_1 = arith.constant 0 : i32
    return %c0_i32, %c0_i32_0 : i32, i32
  }
  func.func @transform_3(%arg0: i32) -> (i32, i32) {
    %c0_i32 = arith.constant 0 : i32
    %c0_i32_0 = arith.constant 0 : i32
    %c0_i32_1 = arith.constant 0 : i32
    return %c0_i32, %c0_i32_0 : i32, i32
  }
  func.func @transform_4(%arg0: i32) -> i32 {
    %c0_i32 = arith.constant 0 : i32
    %c0_i32_0 = arith.constant 0 : i32
    return %c0_i32 : i32
  }
  func.func @transform_5(%arg0: i32) -> (i32, i32) {
    %c0_i32 = arith.constant 0 : i32
    %c0_i32_0 = arith.constant 0 : i32
    return %c0_i32, %arg0 : i32, i32
  }
}

</mosaic_0001>

<bundles_post_ra>
// kernel: pinn_forward.1
= control target key start
LH: loop header
LB: loop body
LE: loop exit
PB: predicated region body
PF: predicated region fallthrough
CT: control target
= control target key end

     0   :  { %vm118_vm0 = vcmask 64512   ;;  %v636_v3 = vmov 0   ;;  %s936_s0 = inlined_call_operand.vmem [shape: f32[256,8], index: 0, kind: input, shape index: {}]   ;;  %s937_s1 = inlined_call_operand.vmem [shape: f32[64,8], index: 1, kind: input, shape index: {}]   ;;  %s938_s2 = inlined_call_operand.vmem [shape: f32[64,1], index: 2, kind: input, shape index: {}]   ;;  %s939_s3 = inlined_call_operand.vmem [shape: f32[64,1], index: 3, kind: input, shape index: {}]   ;;  %s940_s4 = inlined_call_operand.<no memory space> [shape: f32[1], index: 4, kind: input, shape index: {}]   ;;  %s941_s5 = inlined_call_operand.vmem [shape: f32[1,256], index: 5, kind: output, shape index: {}]  }
   0x1   :  { %v62_v0 = vld [vmem:[%s936_s0 + $0x80] sm:$0xff]  ;;  %v63_v1 = vld [vmem:[%s936_s0 + $0x88] sm:$0xff]  ;;  %vm676_vm1 = vmpackc.low %vm118_vm0, %vm118_vm0  ;;  %634 = vset.pattern.permute.xlu0 %v636_v3  ;;  %635 = vset.pattern.permute.xlu1 %v636_v3 }
   0x2   :  { %v568_v4 = vpack.c.bf16 %v63_v1, %v62_v0  ;;  %v46_v5 = vld [vmem:[%s936_s0] sm:$0xff]  ;;  %v47_v6 = vld [vmem:[%s936_s0 + $0x8] sm:$0xff]  ;;  %v64_v7 = vld [vmem:[%s936_s0 + $0x90] sm:$0xff] }
   0x3   :  { %v571_v8 = vpack.c.bf16 %v47_v6, %v46_v5  ;;  %v65_v9 = vld [vmem:[%s936_s0 + $0x98] sm:$0xff]  ;;  %v48_v11 = vld [vmem:[%s936_s0 + $0x10] sm:$0xff]  ;;  %v66_v13 = vld [vmem:[%s936_s0 + $0xa0] sm:$0xff] }
   0x4   :  { %570 = vmatprep.subr.msk.bf16.mxu0 %vm676_vm1, %v568_v4  ;;  %616 = vmatprep.subr.msk.bf16.mxu1 %vm676_vm1, %v568_v4  ;;  %v574_v10 = vpack.c.bf16 %v65_v9, %v64_v7  ;;  %v49_v12 = vld [vmem:[%s936_s0 + $0x18] sm:$0xff]  ;;  %v67_v14 = vld [vmem:[%s936_s0 + $0xa8] sm:$0xff]  ;;  %v719_v17 = vld [vmem:[%s937_s1] sm:$0xff] }
   0x5   :  { %573 = vmatpush3.bf16.xpose.msk.msra.mxu0 %vm676_vm1, %v571_v8  ;;  %624 = vmatpush3.bf16.xpose.msk.msra.mxu1 %vm676_vm1, %v571_v8  ;;  %v577_v15 = vpack.c.bf16 %v49_v12, %v48_v11  ;;  %v580_v16 = vpack.c.bf16 %v67_v14, %v66_v13  ;;  %v724_v18 = vld [vmem:[%s937_s1 + $0x20] sm:$0xff]  ;;  %v51_v20 = vld [vmem:[%s936_s0 + $0x28] sm:$0xff]  ;;  %v68_v22 = vld [vmem:[%s936_s0 + $0xb0] sm:$0xff] }
   0x6   :  { %576 = vmatprep.subr.msk.bf16.mxu0 %vm676_vm1, %v574_v10  ;;  %617 = vmatprep.subr.msk.bf16.mxu1 %vm676_vm1, %v574_v10  ;;  %v50_v19 = vld [vmem:[%s936_s0 + $0x20] sm:$0xff]  ;;  %v69_v23 = vld [vmem:[%s936_s0 + $0xb8] sm:$0xff]  ;;  %v31_v24 = vld [vmem:[%s938_s2 + $0x10] sm:$0xff] }
   0x7   :  { %v29_v21 = vld [vmem:[%s938_s2] sm:$0xff]  ;;  %552 = vmatprep.mubr.msk.f32.mxu0 %vm118_vm0, %v719_v17  ;;  %560 = vmatprep.mubr.msk.f32.mxu1 %vm118_vm0, %v724_v18  ;;  %v583_v25 = vpack.c.bf16 %v51_v20, %v50_v19  ;;  %v30_v26 = vld [vmem:[%s938_s2 + $0x8] sm:$0xff]  ;;  %v32_v27 = vld [vmem:[%s938_s2 + $0x18] sm:$0xff]  ;;  %v586_v28 = vpack.c.bf16 %v69_v23, %v68_v22 }
   0x8   :  { %80 = vperm.xlu0 %634, %v29_v21   ;;  %90 = vperm.xlu1 %635, %v31_v24   ;;  %v37_v29 = vld [vmem:[%s939_s3] sm:$0xff]  ;;  %v38_v30 = vld [vmem:[%s939_s3 + $0x8] sm:$0xff]  ;;  %v52_v31 = vld [vmem:[%s936_s0 + $0x30] sm:$0xff] }
   0x9   :  { %v53_v32 = vld [vmem:[%s936_s0 + $0x38] sm:$0xff]  ;;  %v70_v33 = vld [vmem:[%s936_s0 + $0xc0] sm:$0xff]  ;;  %v71_v34 = vld [vmem:[%s936_s0 + $0xc8] sm:$0xff] }
   0xa   :  { %v589_v35 = vpack.c.bf16 %v53_v32, %v52_v31  ;;  %v33_v36 = vld [vmem:[%s938_s2 + $0x20] sm:$0xff]  ;;  %v39_v37 = vld [vmem:[%s939_s3 + $0x10] sm:$0xff]  ;;  %v592_v38 = vpack.c.bf16 %v71_v34, %v70_v33  ;;  %v34_v39 = vld [vmem:[%s938_s2 + $0x28] sm:$0xff] }
   0xb   :  { %v40_v40 = vld [vmem:[%s939_s3 + $0x18] sm:$0xff]  ;;  %v54_v41 = vld [vmem:[%s936_s0 + $0x40] sm:$0xff]  ;;  %v55_v42 = vld [vmem:[%s936_s0 + $0x48] sm:$0xff] }
   0xc   :  { %85 = vperm.xlu0 %634, %v30_v26   ;;  %95 = vperm.xlu1 %635, %v32_v27   ;;  %v72_v43 = vld [vmem:[%s936_s0 + $0xd0] sm:$0xff]  ;;  %v73_v44 = vld [vmem:[%s936_s0 + $0xd8] sm:$0xff]  ;;  %v595_v45 = vpack.c.bf16 %v55_v42, %v54_v41  ;;  %v41_v47 = vld [vmem:[%s939_s3 + $0x20] sm:$0xff] }
   0xd   :  { %579 = vmatpush3.bf16.xpose.msk.msra.mxu0 %vm676_vm1, %v577_v15  ;;  %625 = vmatpush3.bf16.xpose.msk.msra.mxu1 %vm676_vm1, %v577_v15  ;;  %v35_v46 = vld [vmem:[%s938_s2 + $0x30] sm:$0xff]  ;;  %v598_v48 = vpack.c.bf16 %v73_v44, %v72_v43  ;;  %v36_v49 = vld [vmem:[%s938_s2 + $0x38] sm:$0xff]  ;;  %v42_v50 = vld [vmem:[%s939_s3 + $0x28] sm:$0xff] }
   0xe   :  { %582 = vmatprep.subr.msk.bf16.mxu0 %vm676_vm1, %v580_v16  ;;  %618 = vmatprep.subr.msk.bf16.mxu1 %vm676_vm1, %v580_v16  ;;  %v56_v51 = vld [vmem:[%s936_s0 + $0x50] sm:$0xff]  ;;  %v57_v52 = vld [vmem:[%s936_s0 + $0x58] sm:$0xff]  ;;  %v74_v53 = vld [vmem:[%s936_s0 + $0xe0] sm:$0xff] }
   0xf   :  { %v75_v54 = vld [vmem:[%s936_s0 + $0xe8] sm:$0xff]  ;;  %v601_v55 = vpack.c.bf16 %v57_v52, %v56_v51  ;;  %v43_v56 = vld [vmem:[%s939_s3 + $0x30] sm:$0xff]  ;;  %v44_v57 = vld [vmem:[%s939_s3 + $0x38] sm:$0xff] }
  0x10   :  { %370 = vperm.xlu0 %634, %v37_v29   ;;  %375 = vperm.xlu1 %635, %v38_v30   ;;  %v604_v58 = vpack.c.bf16 %v75_v54, %v74_v53  ;;  %v58_v59 = vld [vmem:[%s936_s0 + $0x60] sm:$0xff]  ;;  %v59_v60 = vld [vmem:[%s936_s0 + $0x68] sm:$0xff]  ;;  %v76_v61 = vld [vmem:[%s936_s0 + $0xf0] sm:$0xff] }
  0x11   :  { %v77_v62 = vld [vmem:[%s936_s0 + $0xf8] sm:$0xff]  ;;  %v607_v63 = vpack.c.bf16 %v59_v60, %v58_v59  ;;  %v60_v1 = vld [vmem:[%s936_s0 + $0x70] sm:$0xff]  ;;  %v22_v5 = vld [vmem:[%s937_s1 + $0x8] sm:$0xff] }
  0x12   :  { %v610_v0 = vpack.c.bf16 %v77_v62, %v76_v61  ;;  %v61_v3 = vld [vmem:[%s936_s0 + $0x78] sm:$0xff]  ;;  %v26_v6 = vld [vmem:[%s937_s1 + $0x28] sm:$0xff]  ;;  %v23_v2 = vld [vmem:[%s937_s1 + $0x10] sm:$0xff] }
  0x13   :  { %v613_v4 = vpack.c.bf16 %v61_v3, %v60_v1  ;;  %v27_v7 = vld [vmem:[%s937_s1 + $0x30] sm:$0xff]  ;;  %v24_v8 = vld [vmem:[%s937_s1 + $0x18] sm:$0xff] }
  0x14   :  { %100 = vperm.xlu0 %634, %v33_v36   ;;  %380 = vperm.xlu1 %635, %v39_v37   ;;  %v28_v9 = vld [vmem:[%s937_s1 + $0x38] sm:$0xff] }
  0x15   :  { %585 = vmatpush3.bf16.xpose.msk.msra.mxu0 %vm676_vm1, %v583_v25  ;;  %626 = vmatpush3.bf16.xpose.msk.msra.mxu1 %vm676_vm1, %v583_v25 }
  0x16   :  { %588 = vmatprep.subr.msk.bf16.mxu0 %vm676_vm1, %v586_v28  ;;  %619 = vmatprep.subr.msk.bf16.mxu1 %vm676_vm1, %v586_v28 }
  0x18   :  { %105 = vperm.xlu0 %634, %v34_v39   ;;  %385 = vperm.xlu1 %635, %v40_v40  }
  0x1c   :  { %110 = vperm.xlu0 %634, %v35_v46   ;;  %390 = vperm.xlu1 %635, %v41_v47  }
  0x1d   :  { %591 = vmatpush3.bf16.xpose.msk.msra.mxu0 %vm676_vm1, %v589_v35  ;;  %627 = vmatpush3.bf16.xpose.msk.msra.mxu1 %vm676_vm1, %v589_v35 }
  0x1e   :  { %594 = vmatprep.subr.msk.bf16.mxu0 %vm676_vm1, %v592_v38  ;;  %620 = vmatprep.subr.msk.bf16.mxu1 %vm676_vm1, %v592_v38 }
  0x20   :  { %115 = vperm.xlu0 %634, %v36_v49   ;;  %395 = vperm.xlu1 %635, %v42_v50  }
  0x24   :  { %400 = vperm.xlu0 %634, %v43_v56   ;;  %405 = vperm.xlu1 %635, %v44_v57  }
  0x25   :  { %597 = vmatpush3.bf16.xpose.msk.msra.mxu0 %vm676_vm1, %v595_v45  ;;  %628 = vmatpush3.bf16.xpose.msk.msra.mxu1 %vm676_vm1, %v595_v45 }
  0x26   :  { %600 = vmatprep.subr.msk.bf16.mxu0 %vm676_vm1, %v598_v48  ;;  %621 = vmatprep.subr.msk.bf16.mxu1 %vm676_vm1, %v598_v48 }
  0x2d   :  { %603 = vmatpush3.bf16.xpose.msk.msra.mxu0 %vm676_vm1, %v601_v55  ;;  %629 = vmatpush3.bf16.xpose.msk.msra.mxu1 %vm676_vm1, %v601_v55 }
  0x2e   :  { %606 = vmatprep.subr.msk.bf16.mxu0 %vm676_vm1, %v604_v58  ;;  %622 = vmatprep.subr.msk.bf16.mxu1 %vm676_vm1, %v604_v58 }
  0x35   :  { %609 = vmatpush3.bf16.xpose.msk.msra.mxu0 %vm676_vm1, %v607_v63  ;;  %630 = vmatpush3.bf16.xpose.msk.msra.mxu1 %vm676_vm1, %v607_v63 }
  0x36   :  { %612 = vmatprep.subr.msk.bf16.mxu0 %vm676_vm1, %v610_v0  ;;  %623 = vmatprep.subr.msk.bf16.mxu1 %vm676_vm1, %v610_v0 }
  0x3d   :  { %615 = vmatpush3.bf16.xpose.msk.msra.mxu0 %vm676_vm1, %v613_v4  ;;  %631 = vmatpush3.bf16.xpose.msk.msra.mxu1 %vm676_vm1, %v613_v4 }
  0x44   :  { %553 = vmatmul.mubr.msk.f32.vlgmr.msra.gmra.mrb[0].mxu0 %vm118_vm0, %v719_v17  ;;  %561 = vmatmul.mubr.msk.f32.vlgmr.msra.gmra.mrb[0].mxu1 %vm118_vm0, %v724_v18 }
  0x45   :  { %554 = vmatprep.mubr.msk.f32.mxu0 %vm118_vm0, %v22_v5  ;;  %562 = vmatprep.mubr.msk.f32.mxu1 %vm118_vm0, %v26_v6 }
  0x48   :  { %555 = vmatmul.mubr.msk.f32.gmra.mrb[2].mxu0 %vm118_vm0, %v22_v5  ;;  %563 = vmatmul.mubr.msk.f32.gmra.mrb[2].mxu1 %vm118_vm0, %v26_v6 }
  0x49   :  { %556 = vmatprep.mubr.msk.f32.mxu0 %vm118_vm0, %v23_v2  ;;  %564 = vmatprep.mubr.msk.f32.mxu1 %vm118_vm0, %v27_v7 }
  0x4c   :  { %557 = vmatmul.mubr.msk.f32.gmra.mrb[4].mxu0 %vm118_vm0, %v23_v2  ;;  %565 = vmatmul.mubr.msk.f32.gmra.mrb[4].mxu1 %vm118_vm0, %v27_v7 }
  0x4d   :  { %558 = vmatprep.mubr.msk.f32.mxu0 %vm118_vm0, %v24_v8  ;;  %566 = vmatprep.mubr.msk.f32.mxu1 %vm118_vm0, %v28_v9 }
  0x50   :  { %559 = vmatmul.mubr.msk.f32.gmra.mrb[6].mxu0 %vm118_vm0, %v24_v8  ;;  %567 = vmatmul.mubr.msk.f32.gmra.mrb[6].mxu1 %vm118_vm0, %v28_v9 }
  0x87   :  { %v81_v10 = vpop.permute.xlu0 %80  ;;  %v91_v11 = vpop.permute.xlu1 %90 }
  0x8b   :  { %v86_v12 = vpop.permute.xlu0 %85  ;;  %v96_v13 = vpop.permute.xlu1 %95 }
  0x8f   :  { %v371_v14 = vpop.permute.xlu0 %370  ;;  %v376_v15 = vpop.permute.xlu1 %375 }
  0x93   :  { %v101_v16 = vpop.permute.xlu0 %100  ;;  %v381_v17 = vpop.permute.xlu1 %380 }
  0x97   :  { %v106_v24 = vpop.permute.xlu0 %105  ;;  %v386_v25 = vpop.permute.xlu1 %385 }
  0x9b   :  { %v111_v43 = vpop.permute.xlu0 %110  ;;  %v391_v47 = vpop.permute.xlu1 %390 }
  0x9f   :  { %v116_v5 = vpop.permute.xlu0 %115 }
 0x117   :  { %v305_v18 = vpop.f32.mrb[0].mxu0  ;;  %v329_v19 = vpop.f32.mrb[0].mxu1 }
 0x118   :  { %v306_v20 = vadd.f32 %v305_v18, %v81_v10  ;;  %v307_v21 = vpop.f32.mrb[1].mxu0  ;;  %v331_v22 = vpop.f32.mrb[1].mxu1  ;;  %v330_v48 = vadd.f32 %v329_v19, %v101_v16 }
 0x119   :  { %v308_v23 = vadd.f32 %v307_v21, %v81_v10  ;;  %v332_v51 = vadd.f32 %v331_v22, %v101_v16 }
 0x11a   :  { %v352_v28 = vmax.f32 %v306_v20, 0.0  ;;  %v360_v0 = vmax.f32 %v330_v48, 0.0  ;;  %v459_v48 = vlaneseq }
 0x11b   :  { %v311_v26 = vpop.f32.mrb[2].mxu0  ;;  %v335_v27 = vpop.f32.mrb[2].mxu1  ;;  %v353_v32 = vmax.f32 %v308_v23, 0.0  ;;  %v361_v6 = vmax.f32 %v332_v51, 0.0 }
 0x11c   :  { %v312_v29 = vadd.f32 %v311_v26, %v86_v12  ;;  %v313_v30 = vpop.f32.mrb[3].mxu0  ;;  %v337_v31 = vpop.f32.mrb[3].mxu1  ;;  %v408_v38 = vmul.f32 %v371_v14, %v352_v28  ;;  %v336_v56 = vadd.f32 %v335_v27, %v106_v24  ;;  %v416_v18 = vmul.f32 %v391_v47, %v360_v0 }
 0x11d   :  { %v314_v33 = vadd.f32 %v313_v30, %v86_v12  ;;  %v409_v44 = vmul.f32 %v371_v14, %v353_v32  ;;  %v338_v61 = vadd.f32 %v337_v31, %v106_v24  ;;  %v396_v12 = vpop.permute.xlu1 %395  ;;  %v401_v26 = vpop.permute.xlu0 %400  ;;  %vm473_vm2 = vcmp.lt.s32.totalorder %v459_v48, 256 }
 0x11e   :  { %v354_v34 = vmax.f32 %v312_v29, 0.0  ;;  %v362_v9 = vmax.f32 %v336_v56, 0.0 }
 0x11f   :  { %v355_v35 = vmax.f32 %v314_v33, 0.0  ;;  %v317_v36 = vpop.f32.mrb[4].mxu0  ;;  %v341_v37 = vpop.f32.mrb[4].mxu1  ;;  %v363_v14 = vmax.f32 %v338_v61, 0.0 }
 0x120   :  { %v410_v39 = vmul.f32 %v376_v15, %v354_v34  ;;  %v318_v40 = vadd.f32 %v317_v36, %v91_v11  ;;  %v319_v41 = vpop.f32.mrb[5].mxu0  ;;  %v343_v42 = vpop.f32.mrb[5].mxu1  ;;  %v342_v3 = vadd.f32 %v341_v37, %v111_v43  ;;  %v418_v22 = vmul.f32 %v396_v12, %v362_v9 }
 0x121   :  { %v411_v45 = vmul.f32 %v376_v15, %v355_v35  ;;  %v320_v46 = vadd.f32 %v319_v41, %v91_v11  ;;  %v344_v7 = vadd.f32 %v343_v42, %v111_v43  ;;  %v419_v27 = vmul.f32 %v396_v12, %v363_v14  ;;  %v406_v32 = vpop.permute.xlu1 %405 }
 0x122   :  { %v424_v49 = vadd.f32 %v410_v39, %v408_v38  ;;  %v356_v50 = vmax.f32 %v318_v40, 0.0  ;;  %v364_v19 = vmax.f32 %v342_v3, 0.0 }
 0x123   :  { %v437_v52 = vadd.f32 %v411_v45, %v409_v44  ;;  %v357_v53 = vmax.f32 %v320_v46, 0.0  ;;  %v323_v54 = vpop.f32.mrb[6].mxu0  ;;  %v347_v55 = vpop.f32.mrb[6].mxu1  ;;  %v365_v20 = vmax.f32 %v344_v7, 0.0  ;;  %v637_v46 = vmov 1966171168  }
 0x124   :  { %v412_v57 = vmul.f32 %v381_v17, %v356_v50  ;;  %v324_v58 = vadd.f32 %v323_v54, %v96_v13  ;;  %v325_v59 = vpop.f32.mrb[7].mxu0  ;;  %v349_v60 = vpop.f32.mrb[7].mxu1  ;;  %v348_v11 = vadd.f32 %v347_v55, %v116_v5  ;;  %v420_v30 = vmul.f32 %v401_v26, %v364_v19 }
 0x125   :  { %v413_v62 = vmul.f32 %v381_v17, %v357_v53  ;;  %v326_v63 = vadd.f32 %v325_v59, %v96_v13  ;;  %v350_v16 = vadd.f32 %v349_v60, %v116_v5  ;;  %v417_v13 = vmul.f32 %v391_v47, %v361_v6 }
 0x126   :  { %v425_v1 = vadd.f32 %v424_v49, %v412_v57  ;;  %v358_v4 = vmax.f32 %v324_v58, 0.0  ;;  %v366_v24 = vmax.f32 %v348_v11, 0.0  ;;  %v421_v33 = vmul.f32 %v401_v26, %v365_v20 }
 0x127   :  { %v438_v2 = vadd.f32 %v437_v52, %v413_v62  ;;  %v359_v8 = vmax.f32 %v326_v63, 0.0  ;;  %v367_v29 = vmax.f32 %v350_v16, 0.0  ;;  %v457_v47 = vunpack.c.l.s4 %v637_v46 }
 0x128   :  { %v414_v10 = vmul.f32 %v386_v25, %v358_v4  ;;  %v450_v52 = vstv %s940_s4  ;;  %v460_v55 = vshrl.u32 %v459_v48, 7 }
 0x129   :  { %v415_v15 = vmul.f32 %v386_v25, %v359_v8  ;;  %v422_v25 = vmul.f32 %v406_v32, %v366_v24  ;;  %v423_v36 = vmul.f32 %v406_v32, %v367_v29  ;;  %v458_v54 = vunpack.c.0.s8 %v457_v47 }
 0x12a   :  { %v426_v17 = vadd.f32 %v425_v1, %v414_v10 }
 0x12b   :  { %v439_v21 = vadd.f32 %v438_v2, %v415_v15  ;;  %v461_v60 = vsub.s32 %v458_v54, %v460_v55 }
 0x12c   :  { %v427_v23 = vadd.f32 %v426_v17, %v416_v18 }
 0x12d   :  { %v440_v28 = vadd.f32 %v439_v21, %v417_v13 }
 0x12e   :  { %v428_v31 = vadd.f32 %v427_v23, %v418_v22 }
 0x12f   :  { %v441_v34 = vadd.f32 %v440_v28, %v419_v27 }
 0x130   :  { %v429_v35 = vadd.f32 %v428_v31, %v420_v30 }
 0x131   :  { %v442_v37 = vadd.f32 %v441_v34, %v421_v33 }
 0x132   :  { %v430_v38 = vadd.f32 %v429_v35, %v422_v25 }
 0x133   :  { %v443_v39 = vadd.f32 %v442_v37, %v423_v36 }
 0x134   :  { %v431_v40 = vrot.slane %v430_v38, 4 }
 0x135   :  { %v444_v41 = vrot.slane %v443_v39, 4 }
 0x136   :  { %v432_v42 = vadd.f32 %v431_v40, %v430_v38 }
 0x137   :  { %v445_v43 = vadd.f32 %v444_v41, %v443_v39 }
 0x138   :  { %v433_v44 = vrot.slane %v432_v42, 2 }
 0x139   :  { %v446_v45 = vrot.slane %v445_v43, 2 }
 0x13a   :  { %v434_v49 = vadd.f32 %v433_v44, %v432_v42 }
 0x13b   :  { %v447_v50 = vadd.f32 %v446_v45, %v445_v43 }
 0x13c   :  { %v435_v51 = vrot.slane %v434_v49, 1 }
 0x13d   :  { %v448_v53 = vrot.slane %v447_v50, 1 }
 0x13e   :  { %v436_v56 = vadd.f32 %v435_v51, %v434_v49 }
 0x13f   :  { %v449_v57 = vadd.f32 %v448_v53, %v447_v50 }
 0x140   :  { %v451_v58 = vadd.f32 %v450_v52, %v436_v56 }
 0x141   :  { %v452_v59 = vadd.f32 %v450_v52, %v449_v57 }
 0x143   :  { %v455_v61 = vcombine.low %v451_v58, %v452_v59 }
 0x145   :  { %v462_v62 = vrot.slane %v455_v61, %v461_v60 }
 0x147   :  { %v469_v63 = vrot.slane %v462_v62, %v461_v60 }
 0x149   :  { %475 = vst.msk [vmem:[%s941_s5] sm:$0x3] %vm473_vm2, %v469_v63 }

</bundles_post_ra>
